<compile_context>
chip_gen: v6e
topology: v6e:2x2x1
jax: 0.10.0
libtpu: 0.0.40
codegen_flags: <defaults>
</compile_context>

<pallas_src>
import jax
import jax.numpy as jnp
from jax.experimental import pallas as pl
from jax.experimental.pallas import tpu as pltpu

_LANES = 128  # lane width of every packed operand and of the padded output


def _fused_mlp_kernel(x_ref, w_ref, b_ref, o_ref):
    """Fused 3-layer MLP, all operands lane-dense (128 lanes).

    x_ref : (TB, D)        f32   activation block (pipelined over the batch)
    w_ref : (D+256, 128)   bf16  packed weights (VMEM-resident across grid):
              rows [0, D)        -> w1 padded to 128 cols (zeros beyond H)
              rows [D, D+128)    -> w2 padded to (128, 128)
              rows [D+128,D+256) -> w3 padded to (128, 128) (zeros beyond A)
    b_ref : (8, 128)       f32   row 0 = b1, row 1 = b2, row 2 = b3 (zero-padded)
    o_ref : (TB, 128)      f32   lane-dense padded output (cols >= A are zero)
    """
    d = x_ref.shape[1]

    # ---- layer 1: bf16 MXU inputs, f32 accumulation, f32 bias + ReLU ----
    x16 = x_ref[...].astype(jnp.bfloat16)
    h1 = jnp.dot(x16, w_ref[0:d, :], preferred_element_type=jnp.float32)
    h1 = jnp.maximum(h1 + b_ref[0:1, :], 0.0)          # (TB, 128), cols >= H stay 0

    # ---- layer 2 ----
    h2 = jnp.dot(h1.astype(jnp.bfloat16), w_ref[d:d + _LANES, :],
                 preferred_element_type=jnp.float32)
    h2 = jnp.maximum(h2 + b_ref[1:2, :], 0.0)          # (TB, 128), cols >= H stay 0

    # ---- layer 3: lane-dense padded output ----
    o_ref[...] = (jnp.dot(h2.astype(jnp.bfloat16),
                          w_ref[d + _LANES:d + 2 * _LANES, :],
                          preferred_element_type=jnp.float32)
                  + b_ref[2:3, :])


def pack_params(params):
    """One-time packing of the 6 PyTorch-style tensors into 2 kernel operands."""
    w1, b1, w2, b2, w3, b3 = params
    d, h = w1.shape
    a = w3.shape[1]

    wk = jnp.zeros((d + 2 * _LANES, _LANES), jnp.bfloat16)
    wk = wk.at[0:d, 0:h].set(w1.astype(jnp.bfloat16))
    wk = wk.at[d:d + h, 0:h].set(w2.astype(jnp.bfloat16))
    wk = wk.at[d + _LANES:d + _LANES + h, 0:a].set(w3.astype(jnp.bfloat16))

    bk = jnp.zeros((8, _LANES), jnp.float32)
    bk = bk.at[0, 0:h].set(b1.reshape(-1).astype(jnp.float32))
    bk = bk.at[1, 0:h].set(b2.reshape(-1).astype(jnp.float32))
    bk = bk.at[2, 0:a].set(b3.reshape(-1).astype(jnp.float32))
    return wk, bk, a


def _pick_batch_tile(b):
    """Tile rows: >=2 blocks when B >= 16 (v7x megacore), <=512 rows (v5e VMEM)."""
    if b <= 8:
        return b                      # tiny batch: one block equal to the full dim
    half = -(-b // 2)                 # cdiv(b, 2): at least two blocks
    return min(512, ((half + 7) // 8) * 8)


def base_forward(x, wk, bk, num_actions):
    """Forward of Base: flatten (B, ...) -> (B, D), then fused 3-layer MLP."""
    b = x.shape[0]
    d = wk.shape[0] - 2 * _LANES
    xf = x.reshape(b, d)              # metadata-only flatten (== x.view(x.size(0), -1))

    tb = _pick_batch_tile(b)
    grid = (pl.cdiv(b, tb),)

    flops = 2 * b * (d * _LANES + 2 * _LANES * _LANES)
    bytes_accessed = (xf.size * xf.dtype.itemsize
                      + wk.size * 2 + bk.size * 4 + b * _LANES * 4)

    out_padded = pl.pallas_call(
        _fused_mlp_kernel,
        out_shape=jax.ShapeDtypeStruct((b, _LANES), jnp.float32),
        grid=grid,
        in_specs=[
            pl.BlockSpec((tb, d), lambda i: (i, 0)),     # activations: pipelined over B
            pl.BlockSpec(wk.shape, lambda i: (0, 0)),    # weights stay VMEM-resident
            pl.BlockSpec(bk.shape, lambda i: (0, 0)),    # f32 biases, tiny
        ],
        out_specs=pl.BlockSpec((tb, _LANES), lambda i: (i, 0)),
        compiler_params=pltpu.CompilerParams(
            dimension_semantics=("parallel",)),
        cost_estimate=pl.CostEstimate(flops=int(flops), transcendentals=0,
                                      bytes_accessed=int(bytes_accessed)),
    )(xf, wk, bk)
    # Padded cols [A, 128) are exactly 0.0; only safe because they are sliced
    # off here (pad b3 with -inf instead if the padded slab is ever argmax'd).
    return out_padded[:, :num_actions]


def init_params(key, in_features, hidden, num_actions):
    """Deterministic PyTorch-Linear-style init (uniform +/- 1/sqrt(fan_in))."""
    ks = jax.random.split(key, 6)

    def linear(kw, kb, fan_in, fan_out):
        bound = 1.0 / (fan_in ** 0.5)
        w = jax.random.uniform(kw, (fan_in, fan_out), jnp.float32, -bound, bound)
        b = jax.random.uniform(kb, (1, fan_out), jnp.float32, -bound, bound)
        return w, b

    w1, b1 = linear(ks[0], ks[1], in_features, hidden)
    w2, b2 = linear(ks[2], ks[3], hidden, hidden)
    w3, b3 = linear(ks[4], ks[5], hidden, num_actions)
    return (w1, b1, w2, b2, w3, b3)


def _reference_forward(x, params):
    """Pure-f32 reference (PyTorch semantics)."""
    w1, b1, w2, b2, w3, b3 = params
    xf = x.reshape(x.shape[0], -1).astype(jnp.float32)
    h1 = jnp.maximum(xf @ w1 + b1, 0.0)
    h2 = jnp.maximum(h1 @ w2 + b2, 0.0)
    return h2 @ w3 + b3


if __name__ == "__main__":
    # Small shapes consistent with Base(input_shape, num_actions):
    #   input_shape = (4, 16, 16) -> feature_size = 1024, num_actions = 6, batch = 2
    B, C, H, W = 2, 4, 16, 16
    hidden = 32
    num_actions = 6
    in_features = C * H * W

    key = jax.random.PRNGKey(0)
    k_x, k_p, k_xb, k_xc = jax.random.split(key, 4)
    x = jax.random.normal(k_x, (B, C, H, W), dtype=jnp.float32)
    params = init_params(k_p, in_features, hidden, num_actions)

    # One-time parameter packing (bf16 weight slab + tiny f32 bias slab).
    wk, bk, a = pack_params(params)
    fwd = jax.jit(lambda xx: base_forward(xx, wk, bk, a))

    # bf16 weights / bf16-cast activations with f32 accumulation -> compare
    # against the pure-f32 reference at bf16-level tolerance.
    TOL = dict(atol=3e-2, rtol=3e-2)

    # Small-batch check (B=2): single full-array block.
    out = jax.block_until_ready(fwd(x))
    ref = _reference_forward(x, params)
    assert out.shape == (B, num_actions)
    assert jnp.allclose(out, ref, **TOL)

    # Batched check (B=256): two 128-row blocks (both v7x TensorCores busy).
    Bb = 256
    xb = jax.random.normal(k_xb, (Bb, C, H, W), dtype=jnp.float32)
    outb = jax.block_until_ready(fwd(xb))
    refb = _reference_forward(xb, params)
    assert outb.shape == (Bb, num_actions)
    assert jnp.allclose(outb, refb, **TOL)

    # Non-tile-multiple batch (B=200): exercises the cdiv grid / padded
    # trailing block path that replaced the old single-giant-block fallback.
    Bc = 200
    xc = jax.random.normal(k_xc, (Bc, C, H, W), dtype=jnp.float32)
    outc = jax.block_until_ready(fwd(xc))
    refc = _reference_forward(xc, params)
    assert outc.shape == (Bc, num_actions)
    assert jnp.allclose(outc, refc, **TOL)

    print("KERNEL_OK")
</pallas_src>

<mosaic_0001>
module attributes {stable_mosaic.version = 11 : i64} {
  func.func @_fused_mlp_kernel(%arg0: i32, %arg1: memref<2x1024xf32, #tpu.memory_space<vmem>>, %arg2: memref<1280x128xbf16, #tpu.memory_space<vmem>>, %arg3: memref<8x128xf32, #tpu.memory_space<vmem>>, %arg4: memref<2x128xf32, #tpu.memory_space<vmem>>) attributes {dimension_semantics = [#tpu.dimension_semantics<parallel>], iteration_bounds = array<i64: 1>, scalar_prefetch = 0 : i64, scratch_operands = 0 : i64, tpu.core_type = #tpu.core_type<tc>, window_params = [{transform_indices = @transform_0, window_bounds = array<i64: 2, 1024>}, {pipeline_mode = #tpu.pipeline_mode<synchronous>, transform_indices = @transform_1, window_bounds = array<i64: 1280, 128>}, {pipeline_mode = #tpu.pipeline_mode<synchronous>, transform_indices = @transform_2, window_bounds = array<i64: 8, 128>}, {transform_indices = @transform_3, window_bounds = array<i64: 2, 128>}]} {
    %c0 = arith.constant 0 : index
    %c0_0 = arith.constant 0 : index
    %0 = vector.load %arg1[%c0, %c0_0] : memref<2x1024xf32, #tpu.memory_space<vmem>>, vector<2x1024xf32>
    %1 = arith.truncf %0 : vector<2x1024xf32> to vector<2x1024xbf16>
    %c0_1 = arith.constant 0 : index
    %c0_2 = arith.constant 0 : index
    %2 = vector.load %arg2[%c0_1, %c0_2] : memref<1280x128xbf16, #tpu.memory_space<vmem>>, vector<1024x128xbf16>
    %cst = arith.constant dense<0.000000e+00> : vector<2x128xf32>
    %3 = tpu.matmul %1, %2, %cst {dimension_numbers = #tpu.dot_dimension_numbers<[1], [0], [0], [1], [0, 0, 1, 1], [], []>} : vector<2x1024xbf16>, vector<1024x128xbf16>, vector<2x128xf32> -> vector<2x128xf32>
    %c0_3 = arith.constant 0 : index
    %c0_4 = arith.constant 0 : index
    %4 = vector.load %arg3[%c0_3, %c0_4] : memref<8x128xf32, #tpu.memory_space<vmem>>, vector<1x128xf32>
    %5 = vector.broadcast %4 : vector<1x128xf32> to vector<2x128xf32>
    %6 = arith.addf %3, %5 : vector<2x128xf32>
    %cst_5 = arith.constant 0.000000e+00 : f32
    %7 = vector.broadcast %cst_5 : f32 to vector<2x128xf32>
    %8 = arith.maximumf %6, %7 : vector<2x128xf32>
    %9 = arith.truncf %8 : vector<2x128xf32> to vector<2x128xbf16>
    %c1024 = arith.constant 1024 : index
    %c0_6 = arith.constant 0 : index
    %10 = vector.load %arg2[%c1024, %c0_6] : memref<1280x128xbf16, #tpu.memory_space<vmem>>, vector<128x128xbf16>
    %cst_7 = arith.constant dense<0.000000e+00> : vector<2x128xf32>
    %11 = tpu.matmul %9, %10, %cst_7 {dimension_numbers = #tpu.dot_dimension_numbers<[1], [0], [0], [1], [0, 0, 1, 1], [], []>} : vector<2x128xbf16>, vector<128x128xbf16>, vector<2x128xf32> -> vector<2x128xf32>
    %c1 = arith.constant 1 : index
    %c0_8 = arith.constant 0 : index
    %12 = vector.load %arg3[%c1, %c0_8] : memref<8x128xf32, #tpu.memory_space<vmem>>, vector<1x128xf32>
    %13 = vector.broadcast %12 : vector<1x128xf32> to vector<2x128xf32>
    %14 = arith.addf %11, %13 : vector<2x128xf32>
    %cst_9 = arith.constant 0.000000e+00 : f32
    %15 = vector.broadcast %cst_9 : f32 to vector<2x128xf32>
    %16 = arith.maximumf %14, %15 : vector<2x128xf32>
    %17 = arith.truncf %16 : vector<2x128xf32> to vector<2x128xbf16>
    %c1152 = arith.constant 1152 : index
    %c0_10 = arith.constant 0 : index
    %18 = vector.load %arg2[%c1152, %c0_10] : memref<1280x128xbf16, #tpu.memory_space<vmem>>, vector<128x128xbf16>
    %cst_11 = arith.constant dense<0.000000e+00> : vector<2x128xf32>
    %19 = tpu.matmul %17, %18, %cst_11 {dimension_numbers = #tpu.dot_dimension_numbers<[1], [0], [0], [1], [0, 0, 1, 1], [], []>} : vector<2x128xbf16>, vector<128x128xbf16>, vector<2x128xf32> -> vector<2x128xf32>
    %c2 = arith.constant 2 : index
    %c0_12 = arith.constant 0 : index
    %20 = vector.load %arg3[%c2, %c0_12] : memref<8x128xf32, #tpu.memory_space<vmem>>, vector<1x128xf32>
    %21 = vector.broadcast %20 : vector<1x128xf32> to vector<2x128xf32>
    %22 = arith.addf %19, %21 : vector<2x128xf32>
    %c0_13 = arith.constant 0 : index
    %c0_14 = arith.constant 0 : index
    %23 = vector.load %arg4[%c0_13, %c0_14] : memref<2x128xf32, #tpu.memory_space<vmem>>, vector<2x128xf32>
    tpu.vector_store %arg4[%c0_13, %c0_14], %22 {strides = array<i32>} : memref<2x128xf32, #tpu.memory_space<vmem>>, vector<2x128xf32>,
    return
  }
  func.func @transform_0(%arg0: i32) -> (i32, i32) {
    %c0_i32 = arith.constant 0 : i32
    %c0_i32_0 = arith.constant 0 : i32
    return %arg0, %c0_i32 : i32, i32
  }
  func.func @transform_1(%arg0: i32) -> (i32, i32) {
    %c0_i32 = arith.constant 0 : i32
    %c0_i32_0 = arith.constant 0 : i32
    %c0_i32_1 = arith.constant 0 : i32
    return %c0_i32, %c0_i32_0 : i32, i32
  }
  func.func @transform_2(%arg0: i32) -> (i32, i32) {
    %c0_i32 = arith.constant 0 : i32
    %c0_i32_0 = arith.constant 0 : i32
    %c0_i32_1 = arith.constant 0 : i32
    return %c0_i32, %c0_i32_0 : i32, i32
  }
  func.func @transform_3(%arg0: i32) -> (i32, i32) {
    %c0_i32 = arith.constant 0 : i32
    %c0_i32_0 = arith.constant 0 : i32
    return %arg0, %c0_i32 : i32, i32
  }
}

</mosaic_0001>

<bundles_post_ra>
// kernel: _lambda_.1
= control target key start
LH: loop header
LB: loop body
LE: loop exit
PB: predicated region body
PF: predicated region fallthrough
CT: control target
= control target key end

     0   :  { %8 = vsyncpa [#allocation3], 0  ;;  %s1433_s0 = inlined_call_operand.vmem [shape: f32[2,1024], index: 0, kind: input, shape index: {}]   ;;  %s1434_s1 = inlined_call_operand.hbm [shape: bf16[1280,128], index: 1, kind: input, shape index: {}]   ;;  %s1435_s2 = inlined_call_operand.vmem [shape: f32[8,128], index: 2, kind: input, shape index: {}]   ;;  %s1436_s3 = inlined_call_operand.hbm [shape: f32[2,128], index: 3, kind: output, shape index: {}]  }
   0x1   :  { %9 = vsyncpa [#allocation4], 0  ;;  %s1361_s12 = smov [#allocation2]  }
   0x2   :  { %s17_s13 = sshll.u32 %s1361_s12, 4  ;;  %s18_s13 = int_to_ptr.vmem [resolvable:$true] %s17_s13 }
   0x3   :  { %s1325_s14 = scalar_lea.vmem %s18_s13, 10240  ;;  %p1330_p1 = scmp.lt.s32.totalorder %s18_s13, %s18_s13 }
   0x4   :  { %p1326_p0 = scmp.ne.s32.totalorder %s18_s13, %s1325_s14  ;;  %p1331_p2 = scmp.lt.s32.totalorder %s1325_s14, %s1325_s14 }
   0x6   :  { %p1332_p3 = por %p1331_p2, %p1330_p1 }
   0x8   :  { %p1333_p4 = pnand %p1332_p3, %p1326_p0 }
   0xa   :  { %1336 = shalt.err (!%p1333_p4)
}
   0xb   :  { %s1362_s15 = smov 64   ;;  %s1363_s16 = smov 4  }
   0xc   :  { %23 = dma.hbm_to_vmem [thread:$0]  %s1434_s1, 10240, %s18_s13, [#allocation3], %s1362_s15, %s1362_s15, %s1363_s16  }
   0xd   :  { %1357 = dma.done.wait [#allocation3], 10240  }
   0xe   :  { %1358 = vsyncadd [#allocation3], 4294957056  ;;  %v1235_v0 = vld [vmem:[#allocation2 + $0x78] sm:$0xff]   ;;  %v1239_v4 = vld [vmem:[#allocation2 + $0x70] sm:$0xff]   ;;  %v1364_v22 = vmov 1983009808   ;;  %v38_v24 = vlaneseq }
   0xf   :  { %v1236_v1 = vld [vmem:[#allocation2 + $0xf8] sm:$0xff]   ;;  %1082 = vmatprep.subr.bf16.mxu0 %v1235_v0  ;;  %v1240_v5 = vld [vmem:[#allocation2 + $0xf0] sm:$0xff]   ;;  %v1243_v8 = vld [vmem:[#allocation2 + $0x68] sm:$0xff]   ;;  %v36_v23 = vunpack.c.l.s4 %v1364_v22  ;;  %vm1366_vm0 = vmmov 0   ;;  %s1367_s27 = smov [#allocation5]  }
  0x10   :  { %v1237_v2 = vld [vmem:[#allocation2 + $0x38] sm:$0xff]   ;;  %1104 = vmatprep.subr.bf16.mxu1 %v1236_v1  ;;  %v1241_v6 = vld [vmem:[#allocation2 + $0x30] sm:$0xff]   ;;  %v1244_v9 = vld [vmem:[#allocation2 + $0xe8] sm:$0xff]   ;;  %v39_v30 = vshrl.u32 %v38_v24, 7  ;;  %s990_s28 = sshll.u32 %s1367_s27, 4  ;;  %s991_s28 = int_to_ptr.vmem [resolvable:$true] %s990_s28 }
  0x11   :  { %v1238_v3 = vld [vmem:[#allocation2 + $0xb8] sm:$0xff]   ;;  %1083 = vmatpush3.bf16.msra.mxu0 %v1237_v2  ;;  %v1242_v7 = vld [vmem:[#allocation2 + $0xb0] sm:$0xff]   ;;  %v1245_v10 = vld [vmem:[#allocation2 + $0x28] sm:$0xff]   ;;  %v37_v29 = vunpack.c.0.s8 %v36_v23  ;;  %s1337_s29 = scalar_lea.vmem %s991_s28, 32  ;;  %p1342_p6 = scmp.lt.s32.totalorder %s991_s28, %s991_s28 }
  0x12   :  { %1105 = vmatpush3.bf16.msra.mxu1 %v1238_v3  ;;  %1084 = vmatprep.subr.bf16.mxu0 %v1239_v4  ;;  %v1246_v11 = vld [vmem:[#allocation2 + $0xa8] sm:$0xff]   ;;  %v1247_v12 = vld [vmem:[#allocation2 + $0x60] sm:$0xff]   ;;  %v1251_v16 = vld [vmem:[#allocation2 + $0x58] sm:$0xff]   ;;  %p1338_p5 = scmp.ne.s32.totalorder %s991_s28, %s1337_s29  ;;  %p1343_p7 = scmp.lt.s32.totalorder %s1337_s29, %s1337_s29 }
  0x13   :  { %1106 = vmatprep.subr.bf16.mxu1 %v1240_v5  ;;  %v1248_v13 = vld [vmem:[#allocation2 + $0xe0] sm:$0xff]   ;;  %v1252_v17 = vld [vmem:[#allocation2 + $0xd8] sm:$0xff]   ;;  %v1255_v20 = vld [vmem:[#allocation2 + $0x50] sm:$0xff]   ;;  %v1391_v35 = vsub.s32 %v37_v29, %v39_v30 }
  0x14   :  { %v1249_v14 = vld [vmem:[#allocation2 + $0x20] sm:$0xff]   ;;  %v1253_v18 = vld [vmem:[#allocation2 + $0x18] sm:$0xff]   ;;  %v1256_v21 = vld [vmem:[#allocation2 + $0xd0] sm:$0xff]   ;;  %p1344_p8 = por %p1343_p7, %p1342_p6 }
  0x15   :  { %1085 = vmatpush3.bf16.msra.mxu0 %v1241_v6  ;;  %v1250_v15 = vld [vmem:[#allocation2 + $0xa0] sm:$0xff]   ;;  %v1254_v19 = vld [vmem:[#allocation2 + $0x98] sm:$0xff]   ;;  %v1257_v25 = vld [vmem:[#allocation2 + $0x10] sm:$0xff]  }
  0x16   :  { %1107 = vmatpush3.bf16.msra.mxu1 %v1242_v7  ;;  %1086 = vmatprep.subr.bf16.mxu0 %v1243_v8  ;;  %v1258_v26 = vld [vmem:[#allocation2 + $0x90] sm:$0xff]   ;;  %v1259_v27 = vld [vmem:[#allocation2 + $0x48] sm:$0xff]   ;;  %v1263_v33 = vld [vmem:[#allocation2 + $0x40] sm:$0xff]   ;;  %p1345_p9 = pnand %p1344_p8, %p1338_p5 }
  0x17   :  { %1108 = vmatprep.subr.bf16.mxu1 %v1244_v9  ;;  %v1260_v28 = vld [vmem:[#allocation2 + $0xc8] sm:$0xff]   ;;  %v1264_v34 = vld [vmem:[#allocation2 + $0xc0] sm:$0xff]   ;;  %v1268_v41 = vld [vmem:[#allocation2 + $0x178] sm:$0xff]  }
  0x18   :  { %v1261_v31 = vld [vmem:[#allocation2 + $0x8] sm:$0xff]   ;;  %v1265_v36 = vld [vmem:[#allocation2] sm:$0xff]   ;;  %v1269_v42 = vld [vmem:[#allocation2 + $0x1f8] sm:$0xff]  }
  0x19   :  { %1087 = vmatpush3.bf16.msra.mxu0 %v1245_v10  ;;  %v1262_v32 = vld [vmem:[#allocation2 + $0x88] sm:$0xff]   ;;  %v1266_v37 = vld [vmem:[#allocation2 + $0x80] sm:$0xff]   ;;  %v1270_v46 = vld [vmem:[#allocation2 + $0x138] sm:$0xff]  }
  0x1a   :  { %1109 = vmatpush3.bf16.msra.mxu1 %v1246_v11  ;;  %1088 = vmatprep.subr.bf16.mxu0 %v1247_v12  ;;  %v30_v38 = vld [vmem:[%s1433_s0] sm:$0xff]  ;;  %v1271_v49 = vld [vmem:[#allocation2 + $0x1b8] sm:$0xff]   ;;  %v1272_v51 = vld [vmem:[#allocation2 + $0x170] sm:$0xff]  }
  0x1b   :  { %1110 = vmatprep.subr.bf16.mxu1 %v1248_v13  ;;  %v41_v39 = vrot.slane %v30_v38, %v1391_v35  ;;  %v34_v40 = vcombine.high %v30_v38, %v30_v38  ;;  %v1273_v53 = vld [vmem:[#allocation2 + $0x1f0] sm:$0xff]   ;;  %v1276_v56 = vld [vmem:[#allocation2 + $0x168] sm:$0xff]   ;;  %v1280_v60 = vld [vmem:[#allocation2 + $0x160] sm:$0xff]  }
  0x1c   :  { %v1274_v54 = vld [vmem:[#allocation2 + $0x130] sm:$0xff]   ;;  %v1277_v57 = vld [vmem:[#allocation2 + $0x1e8] sm:$0xff]   ;;  %v1281_v61 = vld [vmem:[#allocation2 + $0x1e0] sm:$0xff]  }
  0x1d   :  { %1089 = vmatpush3.bf16.msra.mxu0 %v1249_v14  ;;  %v49_v43 = vcombine.high %v41_v39, %v41_v39  ;;  %v48_v44 = vrot.slane %v34_v40, %v1391_v35  ;;  %v76_v45 = vpack.c.bf16 %v41_v39, %v41_v39  ;;  %v1275_v55 = vld [vmem:[#allocation2 + $0x1b0] sm:$0xff]   ;;  %v1278_v58 = vld [vmem:[#allocation2 + $0x128] sm:$0xff]   ;;  %v1282_v62 = vld [vmem:[#allocation2 + $0x120] sm:$0xff]  }
  0x1e   :  { %1111 = vmatpush3.bf16.msra.mxu1 %v1250_v15  ;;  %1090 = vmatprep.subr.bf16.mxu0 %v1251_v16  ;;  %v1279_v59 = vld [vmem:[#allocation2 + $0x1a8] sm:$0xff]   ;;  %v1283_v63 = vld [vmem:[#allocation2 + $0x1a0] sm:$0xff]   ;;  %v1284_v0 = vld [vmem:[#allocation2 + $0x158] sm:$0xff]  }
  0x1f   :  { %1112 = vmatprep.subr.bf16.mxu1 %v1252_v17  ;;  %v77_v47 = vpack.c.bf16 %v49_v43, %v49_v43  ;;  %v50_v48 = vcombine.high %v48_v44, %v48_v44  ;;  %v78_v50 = vpack.c.bf16 %v48_v44, %v48_v44  ;;  %v1285_v1 = vld [vmem:[#allocation2 + $0x1d8] sm:$0xff]   ;;  %v1288_v4 = vld [vmem:[#allocation2 + $0x150] sm:$0xff]   ;;  %v1292_v8 = vld [vmem:[#allocation2 + $0x148] sm:$0xff]  }
  0x20   :  { %v1286_v2 = vld [vmem:[#allocation2 + $0x118] sm:$0xff]   ;;  %v1289_v5 = vld [vmem:[#allocation2 + $0x1d0] sm:$0xff]   ;;  %v1293_v9 = vld [vmem:[#allocation2 + $0x1c8] sm:$0xff]  }
  0x21   :  { %1091 = vmatpush3.bf16.msra.mxu0 %v1253_v18  ;;  %633 = vmatprep.mubr.bf16.mxu0 %v77_v47  ;;  %v79_v52 = vpack.c.bf16 %v50_v48, %v50_v48  ;;  %v1287_v3 = vld [vmem:[#allocation2 + $0x198] sm:$0xff]   ;;  %v1290_v6 = vld [vmem:[#allocation2 + $0x110] sm:$0xff]   ;;  %v1294_v10 = vld [vmem:[#allocation2 + $0x108] sm:$0xff]  }
  0x22   :  { %1113 = vmatpush3.bf16.msra.mxu1 %v1254_v19  ;;  %1092 = vmatprep.subr.bf16.mxu0 %v1255_v20  ;;  %v1291_v7 = vld [vmem:[#allocation2 + $0x190] sm:$0xff]   ;;  %v1295_v11 = vld [vmem:[#allocation2 + $0x188] sm:$0xff]   ;;  %v1296_v12 = vld [vmem:[#allocation2 + $0x140] sm:$0xff]  }
  0x23   :  { %1114 = vmatprep.subr.bf16.mxu1 %v1256_v21  ;;  %673 = vmatprep.mubr.bf16.mxu1 %v79_v52  ;;  %v1297_v13 = vld [vmem:[#allocation2 + $0x1c0] sm:$0xff]   ;;  %v31_v15 = vld [vmem:[%s1433_s0 + $0x8] sm:$0xff]  ;;  %v1313_v39 = vld [vmem:[#allocation2 + $0x258] sm:$0xff]  }
  0x24   :  { %v1298_v14 = vld [vmem:[#allocation2 + $0x100] sm:$0xff]   ;;  %v58_v17 = vrot.slane %v31_v15, %v1391_v35  ;;  %v51_v18 = vcombine.high %v31_v15, %v31_v15  ;;  %v1303_v29 = vld [vmem:[#allocation2 + $0x228] sm:$0xff]   ;;  %v1314_v40 = vld [vmem:[#allocation2 + $0x250] sm:$0xff]  }
  0x25   :  { %1093 = vmatpush3.bf16.msra.mxu0 %v1257_v25  ;;  %v1299_v16 = vld [vmem:[#allocation2 + $0x180] sm:$0xff]  }
  0x26   :  { %1115 = vmatpush3.bf16.msra.mxu1 %v1258_v26  ;;  %1094 = vmatprep.subr.bf16.mxu0 %v1259_v27  ;;  %v66_v19 = vcombine.high %v58_v17, %v58_v17  ;;  %v65_v20 = vrot.slane %v51_v18, %v1391_v35  ;;  %v80_v21 = vpack.c.bf16 %v58_v17, %v58_v17  ;;  %v1301_v26 = vld [vmem:[#allocation2 + $0x238] sm:$0xff]   ;;  %v1365_v27 = vmov 0.0   ;;  %v1304_v30 = vld [vmem:[#allocation2 + $0x220] sm:$0xff]  }
  0x27   :  { %1116 = vmatprep.subr.bf16.mxu1 %v1260_v28  ;;  %v1302_v28 = vld [vmem:[#allocation2 + $0x230] sm:$0xff]   ;;  %v1309_v35 = vld [vmem:[#allocation2 + $0x278] sm:$0xff]   ;;  %v1312_v38 = vld [vmem:[#allocation2 + $0x260] sm:$0xff]  }
  0x28   :  { %v81_v22 = vpack.c.bf16 %v66_v19, %v66_v19  ;;  %v67_v23 = vcombine.high %v65_v20, %v65_v20  ;;  %v82_v24 = vpack.c.bf16 %v65_v20, %v65_v20 }
  0x29   :  { %1095 = vmatpush3.bf16.msra.mxu0 %v1261_v31  ;;  %v1305_v31 = vld [vmem:[#allocation2 + $0x218] sm:$0xff]  }
  0x2a   :  { %1117 = vmatpush3.bf16.msra.mxu1 %v1262_v32  ;;  %1096 = vmatprep.subr.bf16.mxu0 %v1263_v33  ;;  %v83_v25 = vpack.c.bf16 %v67_v23, %v67_v23  ;;  %v1306_v32 = vld [vmem:[#allocation2 + $0x210] sm:$0xff]   ;;  %v1307_v33 = vld [vmem:[#allocation2 + $0x208] sm:$0xff]  }
  0x2b   :  { %1118 = vmatprep.subr.bf16.mxu1 %v1264_v34  ;;  %v1308_v34 = vld [vmem:[#allocation2 + $0x200] sm:$0xff]  }
  0x2d   :  { %1097 = vmatpush3.bf16.msra.mxu0 %v1265_v36  ;;  %v1310_v36 = vld [vmem:[#allocation2 + $0x270] sm:$0xff]  }
  0x2e   :  { %1119 = vmatpush3.bf16.msra.mxu1 %v1266_v37  ;;  %1126 = vmatprep.subr.bf16.mxu0 %v1268_v41  ;;  %v1311_v37 = vld [vmem:[#allocation2 + $0x268] sm:$0xff]  }
  0x2f   :  { %1148 = vmatprep.subr.bf16.mxu1 %v1269_v42 }
  0x30   :  { %634 = vmatmul.mubr.bf16.vlgmr.msra.gmra.mxu0 %v76_v45 }
  0x31   :  { %1127 = vmatpush3.bf16.msra.mxu0 %v1270_v46  ;;  %674 = vmatmul.mubr.bf16.vlgmr.msra.gmra.mxu1 %v78_v50  ;;  %v999_v50 = vld [vmem:[%s1435_s2] ss:$0 sm:$0xff] }
  0x32   :  { %1128 = vmatprep.subr.bf16.mxu0 %v1272_v51  ;;  %1149 = vmatpush3.bf16.msra.mxu1 %v1271_v49 }
  0x33   :  { %1150 = vmatprep.subr.bf16.mxu1 %v1273_v53  ;;  %713 = vmatprep.mubr.bf16.mxu0 %v81_v22 }
  0x34   :  { %753 = vmatprep.mubr.bf16.mxu1 %v83_v25 }
  0x35   :  { %1129 = vmatpush3.bf16.msra.mxu0 %v1274_v54 }
  0x36   :  { %1130 = vmatprep.subr.bf16.mxu0 %v1276_v56  ;;  %1151 = vmatpush3.bf16.msra.mxu1 %v1275_v55 }
  0x37   :  { %1152 = vmatprep.subr.bf16.mxu1 %v1277_v57 }
  0x39   :  { %1131 = vmatpush3.bf16.msra.mxu0 %v1278_v58 }
  0x3a   :  { %1132 = vmatprep.subr.bf16.mxu0 %v1280_v60  ;;  %1153 = vmatpush3.bf16.msra.mxu1 %v1279_v59 }
  0x3b   :  { %1154 = vmatprep.subr.bf16.mxu1 %v1281_v61 }
  0x3d   :  { %1133 = vmatpush3.bf16.msra.mxu0 %v1282_v62 }
  0x3e   :  { %1134 = vmatprep.subr.bf16.mxu0 %v1284_v0  ;;  %1155 = vmatpush3.bf16.msra.mxu1 %v1283_v63 }
  0x3f   :  { %1156 = vmatprep.subr.bf16.mxu1 %v1285_v1 }
  0x41   :  { %1135 = vmatpush3.bf16.msra.mxu0 %v1286_v2 }
  0x42   :  { %1136 = vmatprep.subr.bf16.mxu0 %v1288_v4  ;;  %1157 = vmatpush3.bf16.msra.mxu1 %v1287_v3  ;;  %v1315_v4 = vld [vmem:[#allocation2 + $0x248] sm:$0xff]  }
  0x43   :  { %1158 = vmatprep.subr.bf16.mxu1 %v1289_v5  ;;  %v1316_v5 = vld [vmem:[#allocation2 + $0x240] sm:$0xff]  }
  0x45   :  { %1137 = vmatpush3.bf16.msra.mxu0 %v1290_v6  ;;  %v1064_v6 = vld [vmem:[%s1435_s2 + $0x1] ss:$0 sm:$0xff] }
  0x46   :  { %1138 = vmatprep.subr.bf16.mxu0 %v1292_v8  ;;  %1159 = vmatpush3.bf16.msra.mxu1 %v1291_v7 }
  0x47   :  { %1160 = vmatprep.subr.bf16.mxu1 %v1293_v9 }
  0x49   :  { %1139 = vmatpush3.bf16.msra.mxu0 %v1294_v10 }
  0x4a   :  { %1140 = vmatprep.subr.bf16.mxu0 %v1296_v12  ;;  %1161 = vmatpush3.bf16.msra.mxu1 %v1295_v11 }
  0x4b   :  { %1162 = vmatprep.subr.bf16.mxu1 %v1297_v13 }
  0x4d   :  { %1141 = vmatpush3.bf16.msra.mxu0 %v1298_v14  ;;  %v1073_v14 = vld [vmem:[%s1435_s2 + $0x2] ss:$0 sm:$0xff] }
  0x4e   :  { %1163 = vmatpush3.bf16.msra.mxu1 %v1299_v16  ;;  %1188 = vmatprep.subr.bf16.mxu0 %v1365_v27 }
  0x4f   :  { %1208 = vmatprep.subr.bf16.mxu1 %v1365_v27 }
  0x50   :  { %714 = vmatmul.mubr.bf16.vlgmr.msra.gmra.mxu0 %v80_v21 }
  0x51   :  { %754 = vmatmul.mubr.bf16.vlgmr.msra.gmra.mxu1 %v82_v24  ;;  %1189 = vmatpush3.bf16.msra.mxu0 %v1301_v26 }
  0x52   :  { %1190 = vmatprep.subr.bf16.mxu0 %v1365_v27  ;;  %1204 = vmatprep.mubr.msk.bf16.mxu0 %vm1366_vm0, %v1365_v27 }
  0x53   :  { %1224 = vmatprep.mubr.msk.bf16.mxu1 %vm1366_vm0, %v1365_v27  ;;  %1209 = vmatpush3.bf16.msra.mxu1 %v1309_v35 }
  0x54   :  { %1210 = vmatprep.subr.bf16.mxu1 %v1365_v27 }
  0x55   :  { %1191 = vmatpush3.bf16.msra.mxu0 %v1302_v28 }
  0x56   :  { %1192 = vmatprep.subr.bf16.mxu0 %v1365_v27 }
  0x57   :  { %1211 = vmatpush3.bf16.msra.mxu1 %v1310_v36 }
  0x58   :  { %1212 = vmatprep.subr.bf16.mxu1 %v1365_v27 }
  0x59   :  { %1193 = vmatpush3.bf16.msra.mxu0 %v1303_v29 }
  0x5a   :  { %1194 = vmatprep.subr.bf16.mxu0 %v1365_v27 }
  0x5b   :  { %1213 = vmatpush3.bf16.msra.mxu1 %v1311_v37 }
  0x5c   :  { %1214 = vmatprep.subr.bf16.mxu1 %v1365_v27 }
  0x5d   :  { %1195 = vmatpush3.bf16.msra.mxu0 %v1304_v30 }
  0x5e   :  { %1196 = vmatprep.subr.bf16.mxu0 %v1365_v27 }
  0x5f   :  { %1215 = vmatpush3.bf16.msra.mxu1 %v1312_v38 }
  0x60   :  { %1216 = vmatprep.subr.bf16.mxu1 %v1365_v27 }
  0x61   :  { %1197 = vmatpush3.bf16.msra.mxu0 %v1305_v31 }
  0x62   :  { %1198 = vmatprep.subr.bf16.mxu0 %v1365_v27 }
  0x63   :  { %1217 = vmatpush3.bf16.msra.mxu1 %v1313_v39 }
  0x64   :  { %1218 = vmatprep.subr.bf16.mxu1 %v1365_v27 }
  0x65   :  { %1199 = vmatpush3.bf16.msra.mxu0 %v1306_v32 }
  0x66   :  { %1200 = vmatprep.subr.bf16.mxu0 %v1365_v27 }
  0x67   :  { %1219 = vmatpush3.bf16.msra.mxu1 %v1314_v40 }
  0x68   :  { %1220 = vmatprep.subr.bf16.mxu1 %v1365_v27 }
  0x69   :  { %1201 = vmatpush3.bf16.msra.mxu0 %v1307_v33 }
  0x6a   :  { %1202 = vmatprep.subr.bf16.mxu0 %v1365_v27 }
  0x6b   :  { %1221 = vmatpush3.bf16.msra.mxu1 %v1315_v4 }
  0x6c   :  { %1222 = vmatprep.subr.bf16.mxu1 %v1365_v27 }
  0x6d   :  { %1203 = vmatpush3.bf16.msra.mxu0 %v1308_v34 }
  0x6f   :  { %1223 = vmatpush3.bf16.msra.mxu1 %v1316_v5 }
  0xf0   :  { %v1098_v41 = vpop.f32.mrf.mxu0 }
  0xf1   :  { %v1120_v42 = vpop.f32.mrf.mxu1 }
  0xf2   :  { %v1099_v43 = vpop.f32.mrf.mxu0 }
  0xf3   :  { %v1121_v44 = vpop.f32.mrf.mxu1  ;;  %v1100_v49 = vadd.f32 %v1099_v43, %v1098_v41 }
  0xf4   :  { %v1101_v45 = vpop.f32.mrf.mxu0  ;;  %v1122_v52 = vadd.f32 %v1121_v44, %v1120_v42 }
  0xf5   :  { %v1123_v46 = vpop.f32.mrf.mxu1  ;;  %v636_v51 = vadd.f32 %v1100_v49, %v999_v50 }
  0xf6   :  { %v1102_v47 = vpop.f32.mrf.mxu0 }
  0xf7   :  { %v1124_v48 = vpop.f32.mrf.mxu1  ;;  %v676_v56 = vadd.f32 %v1122_v52, %v636_v51 }
 0x110   :  { %v1142_v53 = vpop.f32.mrf.mxu0 }
 0x111   :  { %v1164_v54 = vpop.f32.mrf.mxu1 }
 0x112   :  { %v1143_v55 = vpop.f32.mrf.mxu0 }
 0x113   :  { %v1144_v57 = vadd.f32 %v1143_v55, %v1142_v53  ;;  %v1165_v58 = vpop.f32.mrf.mxu1 }
 0x114   :  { %v1145_v59 = vpop.f32.mrf.mxu0  ;;  %v1166_v61 = vadd.f32 %v1165_v58, %v1164_v54 }
 0x115   :  { %v716_v60 = vadd.f32 %v1144_v57, %v676_v56  ;;  %v1167_v62 = vpop.f32.mrf.mxu1 }
 0x116   :  { %v1146_v63 = vpop.f32.mrf.mxu0 }
 0x117   :  { %v756_v0 = vadd.f32 %v1166_v61, %v716_v60  ;;  %v1168_v1 = vpop.f32.mrf.mxu1 }
 0x119   :  { %v761_v2 = vmax.f32 %v756_v0, 0.0 }
 0x11b   :  { %v762_v3 = vpack.c.bf16 %v761_v2, %v761_v2 }
 0x11d   :  { %1205 = vmatmul.mubr.bf16.vlgmr.msra.gmra.mxu0 %v762_v3 }
 0x1dd   :  { %v866_v7 = vpop.f32.mrf.mxu0 }
 0x1de   :  { %v867_v8 = vadd.f32 %v1064_v6, %v866_v7 }
 0x1df   :  { %v1206_v9 = vpop.f32.mrf.mxu0 }
 0x1e0   :  { %v872_v10 = vmax.f32 %v867_v8, 0.0 }
 0x1e1   :  { %v869_v11 = vpop.f32.mrf.mxu0 }
 0x1e2   :  { %v873_v12 = vpack.c.bf16 %v872_v10, %v872_v10 }
 0x1e3   :  { %v1207_v13 = vpop.f32.mrf.mxu0 }
 0x1e4   :  { %1225 = vmatmul.mubr.bf16.vlgmr.msra.gmra.mxu1 %v873_v12 }
 0x2a4   :  { %v977_v15 = vpop.f32.mrf.mxu1 }
 0x2a5   :  { %v978_v16 = vadd.f32 %v1073_v14, %v977_v15 }
 0x2a6   :  { %v1226_v17 = vpop.f32.mrf.mxu1 }
 0x2a7   :  { %983 = vst [vmem:[#allocation5] sm:$0x3] %v978_v16 }
 0x2a8   :  { %v980_v18 = vpop.f32.mrf.mxu1 }
 0x2a9   :  { %1348 = shalt.err (!%p1345_p9)
}
 0x2aa   :  { %993 = dma.vmem_to_hbm [thread:$0]  %s991_s28, 32, %s1436_s3, [#allocation4]   ;;  %v1227_v19 = vpop.f32.mrf.mxu1 }
 0x2ab   :  { %1359 = dma.done.wait [#allocation4], 32  }
 0x2ac   :  { %1360 = vsyncadd [#allocation4], 4294967264 }
 0x2ad   :  { %997 = vsyncpa [#allocation3], 1 }
 0x2ae   :  { %998 = vsyncpa [#allocation4], 1 }

</bundles_post_ra>
